<compile_context>
chip_gen: v7x
topology: tpu7x:2x2x1
jax: 0.10.0
libtpu: 0.0.40
codegen_flags: <defaults>
</compile_context>

<pallas_src>
import functools

import jax
import jax.numpy as jnp
from jax.experimental import pallas as pl
from jax.experimental.pallas import tpu as pltpu


def _round_up(n, m):
    return ((n + m - 1) // m) * m


def gcn_kernel(a_ref, xw1_ref, b1_ref, w2_ref, b2_ref, out_ref, *, num_classes):
    # ---- Layer 1: GCNConv = A_hat @ (X @ W1) + b1, then ReLU --------------
    # (X @ W1 is folded into xw1_ref by the prepare step; for identity node
    #  features it is simply W1, so that matmul costs nothing.)
    h1 = jnp.dot(a_ref[...], xw1_ref[...], preferred_element_type=jnp.float32)
    h1 = jnp.maximum(h1 + b1_ref[...], 0.0)

    # Dropout (eval mode): identity.

    # ---- Layer 2: GCNConv = A_hat @ (H1 @ W2) + b2 ------------------------
    hw2 = jnp.dot(h1.astype(w2_ref.dtype), w2_ref[...],
                  preferred_element_type=jnp.float32)
    z = jnp.dot(a_ref[...], hw2.astype(a_ref.dtype),
                preferred_element_type=jnp.float32) + b2_ref[...]

    # ---- log_softmax over classes (last dim padded to 128) ----------------
    # Padded columns are forced to -inf once; exp(-inf) == 0 keeps them out of
    # the sum, and the wrapper slices them off, so no further masking needed.
    col = jax.lax.broadcasted_iota(jnp.int32, z.shape, 1)
    z = jnp.where(col < num_classes, z, -jnp.inf)
    m = jnp.max(z, axis=1, keepdims=True)
    s = z - m
    lse = jnp.log(jnp.sum(jnp.exp(s), axis=1, keepdims=True))
    out_ref[...] = s - lse


@functools.partial(jax.jit, static_argnames=("n", "num_classes"))
def gcn_forward_prepared(a_p, xw1_p, b1_p, w2_p, b2_p, *, n, num_classes):
    """Jitted per-call forward on already padded/cast operands."""
    n_pad = a_p.shape[0]
    h_pad = xw1_p.shape[1]
    c_pad = w2_p.shape[1]

    flops = 2 * (n_pad * n_pad * h_pad     # A_hat @ (XW1)
                 + n_pad * h_pad * c_pad   # H1 @ W2
                 + n_pad * n_pad * c_pad)  # A_hat @ (H1W2)
    transcendentals = n_pad * c_pad + n_pad           # exp + log
    bytes_accessed = ((a_p.size + xw1_p.size + w2_p.size) * 2
                      + (b1_p.size + b2_p.size) * 4
                      + n_pad * c_pad * 4)
    cost = pl.CostEstimate(flops=flops, transcendentals=transcendentals,
                           bytes_accessed=bytes_accessed)

    vmem_spec = pl.BlockSpec(memory_space=pltpu.MemorySpace.VMEM)
    out_padded = pl.pallas_call(
        functools.partial(gcn_kernel, num_classes=num_classes),
        out_shape=jax.ShapeDtypeStruct((n_pad, c_pad), jnp.float32),
        in_specs=[vmem_spec] * 5,
        out_specs=vmem_spec,
        cost_estimate=cost,
    )(a_p, xw1_p, b1_p, w2_p, b2_p)

    # Drop the padded rows / padded class columns (fuses with the call).
    return out_padded[:n, :num_classes]


def prepare_gcn(a_hat, x, w1, b1, w2, b2):
    """One-time: pad + cast the static operands (graph, features, weights)."""
    n = a_hat.shape[0]
    f = x.shape[1]
    hidden = w1.shape[1]
    num_classes = w2.shape[1]
    b1 = b1.reshape(1, -1)
    b2 = b2.reshape(1, -1)

    # Sublane-aligned row count (16 for bf16; also a multiple of 8 for f32 out)
    n_pad = _round_up(n, 16)
    # Lane-facing dims stay 128-dense.
    h_pad = _round_up(hidden, 128)
    c_pad = _round_up(num_classes, 128)

    bf16 = jnp.bfloat16

    # Fold X @ W1 out of the per-call kernel.  KarateClub uses identity node
    # features, so X @ W1 == W1 and the feature-width matmul vanishes.
    if x.shape[0] == x.shape[1] and bool(jnp.all(x == jnp.eye(n, f, dtype=x.dtype))):
        xw1 = w1[:n]
    else:
        xw1 = x @ w1

    a_p = jnp.zeros((n_pad, n_pad), bf16).at[:n, :n].set(a_hat.astype(bf16))
    xw1_p = jnp.zeros((n_pad, h_pad), bf16).at[:n, :hidden].set(xw1.astype(bf16))
    w2_p = jnp.zeros((h_pad, c_pad), bf16).at[:hidden, :num_classes].set(w2.astype(bf16))
    b1_p = jnp.zeros((1, h_pad), jnp.float32).at[:, :hidden].set(b1)
    b2_p = jnp.zeros((1, c_pad), jnp.float32).at[:, :num_classes].set(b2)

    operands = (a_p, xw1_p, b1_p, w2_p, b2_p)
    return operands, n, num_classes


def gcn_forward(a_hat, x, w1, b1, w2, b2):
    """Convenience one-shot wrapper: prepare + jitted forward."""
    operands, n, num_classes = prepare_gcn(a_hat, x, w1, b1, w2, b2)
    return gcn_forward_prepared(*operands, n=n, num_classes=num_classes)


def build_normalized_adjacency(edge_index, num_nodes):
    """Dense A_hat = D^{-1/2} (A + I) D^{-1/2} from a [2, E] edge_index."""
    src, dst = edge_index[0], edge_index[1]
    adj = jnp.zeros((num_nodes, num_nodes), jnp.float32)
    adj = adj.at[src, dst].set(1.0)
    adj = jnp.maximum(adj, adj.T)                                  # symmetrize
    adj = jnp.maximum(adj, jnp.eye(num_nodes, dtype=jnp.float32))  # self loops
    deg = jnp.sum(adj, axis=1)
    d_inv_sqrt = 1.0 / jnp.sqrt(deg)
    return adj * d_inv_sqrt[:, None] * d_inv_sqrt[None, :]


def gcn_reference(a_hat, x, w1, b1, w2, b2):
    """Pure-JAX f32 reference of the same forward pass."""
    h1 = jnp.maximum(a_hat @ (x @ w1) + b1, 0.0)
    z = a_hat @ (h1 @ w2) + b2
    return jax.nn.log_softmax(z, axis=1)


def glorot(key, shape):
    fan_in, fan_out = shape
    limit = jnp.sqrt(6.0 / (fan_in + fan_out))
    return jax.random.uniform(key, shape, jnp.float32, -limit, limit)


if __name__ == "__main__":
    # KarateClub-like sizes: 34 nodes, identity node features (34 dims), 4 classes.
    N = 34
    NUM_FEATURES = 34
    HIDDEN = 16
    NUM_CLASSES = 4
    NUM_EDGES = 78

    key = jax.random.PRNGKey(0)
    k_edge, k_w1, k_w2 = jax.random.split(key, 3)

    # Deterministic synthetic edge_index [2, E]
    edge_index = jax.random.randint(k_edge, (2, NUM_EDGES), 0, N, dtype=jnp.int32)
    a_hat = build_normalized_adjacency(edge_index, N)

    # Node features: identity matrix (as in KarateClub dataset)
    x = jnp.eye(N, NUM_FEATURES, dtype=jnp.float32)

    # Deterministic parameter init (GCNConv: weight [in, out], bias [out])
    w1 = glorot(k_w1, (NUM_FEATURES, HIDDEN))
    b1 = jnp.zeros((1, HIDDEN), jnp.float32)
    w2 = glorot(k_w2, (HIDDEN, NUM_CLASSES))
    b2 = jnp.zeros((1, NUM_CLASSES), jnp.float32)

    # One-time prepare (padding / bf16 casts hoisted out of the forward path).
    operands, n, num_classes = prepare_gcn(a_hat, x, w1, b1, w2, b2)

    out = gcn_forward_prepared(*operands, n=n, num_classes=num_classes)
    jax.block_until_ready(out)

    assert out.shape == (N, NUM_CLASSES)
    # log_softmax rows should sum (in prob space) to ~1
    assert jnp.allclose(jnp.sum(jnp.exp(out), axis=1), 1.0, atol=1e-4)
    # compare against pure-JAX f32 reference (bf16 MXU inputs -> loose tol)
    ref = gcn_reference(a_hat, x, w1, b1, w2, b2)
    assert jnp.max(jnp.abs(out - ref)) < 1e-1, "mismatch vs. f32 reference"
    print("KERNEL_OK")
</pallas_src>

<mosaic_0001>
module attributes {stable_mosaic.version = 11 : i64} {
  func.func @gcn_kernel(%arg0: memref<48x48xbf16, #tpu.memory_space<vmem>>, %arg1: memref<48x128xbf16, #tpu.memory_space<vmem>>, %arg2: memref<1x128xf32, #tpu.memory_space<vmem>>, %arg3: memref<128x128xbf16, #tpu.memory_space<vmem>>, %arg4: memref<1x128xf32, #tpu.memory_space<vmem>>, %arg5: memref<48x128xf32, #tpu.memory_space<vmem>>) attributes {dimension_semantics = [], scalar_prefetch = 0 : i64, scratch_operands = 0 : i64, tpu.core_type = #tpu.core_type<tc>} {
    %c0 = arith.constant 0 : index
    %c0_0 = arith.constant 0 : index
    %0 = vector.load %arg0[%c0, %c0_0] : memref<48x48xbf16, #tpu.memory_space<vmem>>, vector<48x48xbf16>
    %c0_1 = arith.constant 0 : index
    %c0_2 = arith.constant 0 : index
    %1 = vector.load %arg1[%c0_1, %c0_2] : memref<48x128xbf16, #tpu.memory_space<vmem>>, vector<48x128xbf16>
    %cst = arith.constant dense<0.000000e+00> : vector<48x128xf32>
    %2 = tpu.matmul %0, %1, %cst {dimension_numbers = #tpu.dot_dimension_numbers<[1], [0], [0], [1], [0, 0, 1, 1], [], []>} : vector<48x48xbf16>, vector<48x128xbf16>, vector<48x128xf32> -> vector<48x128xf32>
    %c0_3 = arith.constant 0 : index
    %c0_4 = arith.constant 0 : index
    %3 = vector.load %arg2[%c0_3, %c0_4] : memref<1x128xf32, #tpu.memory_space<vmem>>, vector<1x128xf32>
    %4 = vector.broadcast %3 : vector<1x128xf32> to vector<48x128xf32>
    %5 = arith.addf %2, %4 : vector<48x128xf32>
    %cst_5 = arith.constant 0.000000e+00 : f32
    %6 = vector.broadcast %cst_5 : f32 to vector<48x128xf32>
    %7 = arith.maximumf %5, %6 : vector<48x128xf32>
    %8 = arith.truncf %7 : vector<48x128xf32> to vector<48x128xbf16>
    %c0_6 = arith.constant 0 : index
    %c0_7 = arith.constant 0 : index
    %9 = vector.load %arg3[%c0_6, %c0_7] : memref<128x128xbf16, #tpu.memory_space<vmem>>, vector<128x128xbf16>
    %cst_8 = arith.constant dense<0.000000e+00> : vector<48x128xf32>
    %10 = tpu.matmul %8, %9, %cst_8 {dimension_numbers = #tpu.dot_dimension_numbers<[1], [0], [0], [1], [0, 0, 1, 1], [], []>} : vector<48x128xbf16>, vector<128x128xbf16>, vector<48x128xf32> -> vector<48x128xf32>
    %c0_9 = arith.constant 0 : index
    %c0_10 = arith.constant 0 : index
    %11 = vector.load %arg0[%c0_9, %c0_10] : memref<48x48xbf16, #tpu.memory_space<vmem>>, vector<48x48xbf16>
    %12 = arith.truncf %10 : vector<48x128xf32> to vector<48x128xbf16>
    %cst_11 = arith.constant dense<0.000000e+00> : vector<48x128xf32>
    %13 = tpu.matmul %11, %12, %cst_11 {dimension_numbers = #tpu.dot_dimension_numbers<[1], [0], [0], [1], [0, 0, 1, 1], [], []>} : vector<48x48xbf16>, vector<48x128xbf16>, vector<48x128xf32> -> vector<48x128xf32>
    %c0_12 = arith.constant 0 : index
    %c0_13 = arith.constant 0 : index
    %14 = vector.load %arg4[%c0_12, %c0_13] : memref<1x128xf32, #tpu.memory_space<vmem>>, vector<1x128xf32>
    %15 = vector.broadcast %14 : vector<1x128xf32> to vector<48x128xf32>
    %16 = arith.addf %13, %15 : vector<48x128xf32>
    %17 = tpu.iota {dimensions = array<i32: 1>} : vector<48x128xi32>
    %c4_i32 = arith.constant 4 : i32
    %18 = vector.broadcast %c4_i32 : i32 to vector<48x128xi32>
    %19 = arith.cmpi slt, %17, %18 : vector<48x128xi32>
    %cst_14 = arith.constant 0xFF800000 : f32
    %20 = vector.broadcast %cst_14 : f32 to vector<48x128xf32>
    %21 = arith.select %19, %16, %20 : vector<48x128xi1>, vector<48x128xf32>
    %cst_15 = arith.constant dense<0xFF800000> : vector<48xf32>
    %22 = vector.multi_reduction <maximumf>, %21, %cst_15 [1] : vector<48x128xf32> to vector<48xf32>
    %23 = vector.shape_cast %22 : vector<48xf32> to vector<48x1xf32>
    %24 = vector.broadcast %23 : vector<48x1xf32> to vector<48x128xf32>
    %25 = arith.subf %21, %24 : vector<48x128xf32>
    %26 = math.exp %25 : vector<48x128xf32>
    %cst_16 = arith.constant dense<0.000000e+00> : vector<48xf32>
    %27 = vector.multi_reduction <add>, %26, %cst_16 [1] : vector<48x128xf32> to vector<48xf32>
    %28 = vector.shape_cast %27 : vector<48xf32> to vector<48x1xf32>
    %29 = math.log %28 : vector<48x1xf32>
    %30 = vector.broadcast %29 : vector<48x1xf32> to vector<48x128xf32>
    %31 = arith.subf %25, %30 : vector<48x128xf32>
    %c0_17 = arith.constant 0 : index
    %c0_18 = arith.constant 0 : index
    %32 = vector.load %arg5[%c0_17, %c0_18] : memref<48x128xf32, #tpu.memory_space<vmem>>, vector<48x128xf32>
    tpu.vector_store %arg5[%c0_17, %c0_18], %31 {strides = array<i32>} : memref<48x128xf32, #tpu.memory_space<vmem>>, vector<48x128xf32>,
    return
  }
}

</mosaic_0001>

<bundles_post_ra>
// kernel: gcn_forward_prepared.1
= control target key start
LH: loop header
LB: loop body
LE: loop exit
PB: predicated region body
PF: predicated region fallthrough
CT: control target
= control target key end

     0   :  { %10 = vsyncpa [#allocation3], 0  ;;  %s852_s0 = inlined_call_operand.hbm [shape: bf16[48,48], index: 0, kind: input, shape index: {}]   ;;  %s853_s1 = inlined_call_operand.hbm [shape: bf16[48,128], index: 1, kind: input, shape index: {}]   ;;  %s854_s2 = inlined_call_operand.vmem [shape: f32[1,128], index: 2, kind: input, shape index: {}]   ;;  %s855_s3 = inlined_call_operand.hbm [shape: bf16[128,128], index: 3, kind: input, shape index: {}]   ;;  %s856_s4 = inlined_call_operand.vmem [shape: f32[1,128], index: 4, kind: input, shape index: {}]   ;;  %s857_s5 = inlined_call_operand.vmem [shape: f32[48,128], index: 5, kind: output, shape index: {}]  }
   0x1   :  { %11 = vsyncpa [#allocation5], 0  ;;  %s683_s18 = smov [#allocation4]   ;;  %s684_s20 = smov [#allocation2]  }
   0x2   :  { %s29_s19 = sshll.u32 %s683_s18, 4  ;;  %s17_s21 = sshll.u32 %s684_s20, 4  ;;  %s30_s19 = int_to_ptr.vmem [resolvable:$true] %s29_s19  ;;  %s720_s21 = int_to_ptr.vmem [resolvable:$true] %s17_s21 }
   0x3   :  { %s613_s24 = scalar_lea.hbm %s853_s1, 384 }
   0x4   :  { %p614_p0 = scmp.ne.s32.totalorder %s853_s1, %s613_s24  ;;  %p617_p1 = scmp.lt.u32.totalorder %s613_s24, %s853_s1 }
   0x6   :  { %p619_p2 = pnand %p617_p1, %p614_p0 }
   0x8   :  { %622 = shalt.err (!%p619_p2)
}
   0x9   :  { %s623_s29 = scalar_lea.vmem %s30_s19, 384  ;;  %p628_p4 = scmp.lt.s32.totalorder %s30_s19, %s30_s19 }
   0xa   :  { %p624_p3 = scmp.ne.s32.totalorder %s30_s19, %s623_s29  ;;  %p629_p5 = scmp.lt.s32.totalorder %s623_s29, %s623_s29 }
   0xc   :  { %p630_p6 = por %p629_p5, %p628_p4 }
   0xe   :  { %p631_p7 = pnand %p630_p6, %p624_p3 }
  0x10   :  { %634 = shalt.err (!%p631_p7)
}
  0x11   :  { %s685_s30 = smov 64   ;;  %s686_s6 = smov 4  }
  0x12   :  { %35 = dma.hbm_to_vmem [thread:$0]  %s853_s1, 384, %s30_s19, [#allocation5], %s685_s30, %s685_s30, %s686_s6  }
  0x13   :  { %s635_s11 = scalar_lea.hbm %s852_s0, 384 }
  0x14   :  { %p636_p8 = scmp.ne.s32.totalorder %s852_s0, %s635_s11  ;;  %p639_p9 = scmp.lt.u32.totalorder %s635_s11, %s852_s0 }
  0x16   :  { %p641_p10 = pnand %p639_p9, %p636_p8 }
  0x18   :  { %644 = shalt.err (!%p641_p10)
}
  0x19   :  { %s645_s16 = scalar_lea.vmem %s720_s21, 384  ;;  %p650_p12 = scmp.lt.s32.totalorder %s720_s21, %s720_s21 }
  0x1a   :  { %p646_p11 = scmp.ne.s32.totalorder %s720_s21, %s645_s16  ;;  %p651_p13 = scmp.lt.s32.totalorder %s645_s16, %s645_s16 }
  0x1c   :  { %p652_p0 = por %p651_p13, %p650_p12 }
  0x1e   :  { %p653_p1 = pnand %p652_p0, %p646_p11 }
  0x20   :  { %656 = shalt.err (!%p653_p1)
}
  0x21   :  { %23 = dma.hbm_to_vmem [thread:$0]  %s852_s0, 384, %s720_s21, [#allocation3], %s685_s30, %s685_s30, %s686_s6  }
  0x22   :  { %s687_s18 = smov [#allocation6]   ;;  %s657_s23 = scalar_lea.hbm %s855_s3, 1024 }
  0x23   :  { %s43_s19 = sshll.u32 %s687_s18, 4  ;;  %p658_p2 = scmp.ne.s32.totalorder %s855_s3, %s657_s23  ;;  %s44_s19 = int_to_ptr.vmem [resolvable:$true] %s43_s19 }
  0x24   :  { %p661_p3 = scmp.lt.u32.totalorder %s657_s23, %s855_s3 }
  0x26   :  { %p663_p4 = pnand %p661_p3, %p658_p2 }
  0x28   :  { %666 = shalt.err (!%p663_p4)
}
  0x29   :  { %s667_s28 = scalar_lea.vmem %s44_s19, 1024  ;;  %p672_p6 = scmp.lt.s32.totalorder %s44_s19, %s44_s19 }
  0x2a   :  { %p668_p5 = scmp.ne.s32.totalorder %s44_s19, %s667_s28  ;;  %p673_p7 = scmp.lt.s32.totalorder %s667_s28, %s667_s28 }
  0x2c   :  { %p674_p8 = por %p673_p7, %p672_p6 }
  0x2e   :  { %p675_p9 = pnand %p674_p8, %p668_p5 }
  0x30   :  { %678 = shalt.err (!%p675_p9)
}
  0x31   :  { %49 = dma.hbm_to_vmem [thread:$0]  %s855_s3, 1024, %s44_s19, [#allocation5], %s685_s30, %s685_s30, %s686_s6  }
  0x32   :  { %679 = dma.done.wait [#allocation3], 384  }
  0x33   :  { %680 = vsyncadd [#allocation3], 4294966912 }
  0x34   :  { %681 = dma.done.wait [#allocation5], 1408  }
  0x35   :  { %682 = vsyncadd [#allocation5], 4294965888  ;;  %v688_v0 = vmov 0.0   ;;  %vm689_vm0 = vmmov 0   ;;  %v575_v1 = vld [vmem:[#allocation4] sm:$0xff]   ;;  %v576_v2 = vld [vmem:[#allocation4 + $0x8] sm:$0xff]   ;;  %v378_v58 = vlaneseq }
  0x36   :  { %504 = vmatprep.subr.bf16.mxu0 %v688_v0  ;;  %510 = vmatprep.mubr.msk.bf16.mxu0 %vm689_vm0, %v688_v0  ;;  %v577_v3 = vld [vmem:[#allocation4 + $0x10] sm:$0xff]   ;;  %v581_v4 = vld [vmem:[#allocation6] sm:$0xff]   ;;  %v582_v5 = vld [vmem:[#allocation6 + $0x8] sm:$0xff]   ;;  %vm114_vm1 = vcmask 392192  }
  0x37   :  { %522 = vmatprep.subr.bf16.mxu1 %v688_v0  ;;  %538 = vmatprep.mubr.msk.bf16.mxu1 %vm689_vm0, %v688_v0  ;;  %v780_v6 = vld [vmem:[#allocation2] sm:$0xff]   ;;  %v584_v8 = vld [vmem:[#allocation6 + $0x18] sm:$0xff]   ;;  %v585_v10 = vld [vmem:[#allocation6 + $0x20] sm:$0xff]   ;;  %v379_v59 = vand.u32 127, %v378_v58 }
  0x38   :  { %505 = vmatpush3.bf16.msra.mxu0 %v575_v1  ;;  %523 = vmatpush3.bf16.msra.mxu1 %v581_v4  ;;  %v583_v7 = vld [vmem:[#allocation6 + $0x10] sm:$0xff]   ;;  %v789_v9 = vld [vmem:[#allocation2 + $0x8] sm:$0xff]   ;;  %v586_v11 = vld [vmem:[#allocation6 + $0x28] sm:$0xff]  }
  0x39   :  { %506 = vmatprep.subr.bf16.mxu0 %v688_v0  ;;  %524 = vmatprep.subr.bf16.mxu1 %v688_v0  ;;  %v797_v12 = vld [vmem:[#allocation2 + $0x10] sm:$0xff]   ;;  %v587_v13 = vld [vmem:[#allocation6 + $0x30] sm:$0xff]   ;;  %v588_v14 = vld [vmem:[#allocation6 + $0x38] sm:$0xff]   ;;  %vm380_vm2 = vcmp.lt.s32.totalorder %v379_v59, 4 }
  0x3a   :  { %v459_v15 = vld [vmem:[%s854_s2] ss:$0 sm:$0xff] }
  0x3b   :  { %v477_v60 = vld [vmem:[%s856_s4] ss:$0 sm:$0xff] }
  0x3c   :  { %507 = vmatpush3.bf16.msra.mxu0 %v576_v2  ;;  %525 = vmatpush3.bf16.msra.mxu1 %v582_v5 }
  0x3d   :  { %508 = vmatprep.subr.bf16.mxu0 %v688_v0  ;;  %526 = vmatprep.subr.bf16.mxu1 %v688_v0 }
  0x40   :  { %509 = vmatpush3.bf16.msra.mxu0 %v577_v3  ;;  %527 = vmatpush3.bf16.msra.mxu1 %v583_v7 }
  0x41   :  { %550 = vmatprep.subr.bf16.mxu0 %v688_v0  ;;  %528 = vmatprep.subr.bf16.mxu1 %v688_v0 }
  0x43   :  { %511 = vmatmul.mubr.msk.bf16.vlgmr.msra.gmra.mrb[0].mxu0 %vm114_vm1, %v780_v6 }
  0x44   :  { %514 = vmatprep.mubr.msk.bf16.mxu0 %vm689_vm0, %v688_v0  ;;  %529 = vmatpush3.bf16.msra.mxu1 %v584_v8 }
  0x45   :  { %530 = vmatprep.subr.bf16.mxu1 %v688_v0 }
  0x48   :  { %531 = vmatpush3.bf16.msra.mxu1 %v585_v10 }
  0x49   :  { %532 = vmatprep.subr.bf16.mxu1 %v688_v0 }
  0x4b   :  { %515 = vmatmul.mubr.msk.bf16.gmra.mrb[4].mxu0 %vm114_vm1, %v789_v9 }
  0x4c   :  { %518 = vmatprep.mubr.msk.bf16.mxu0 %vm689_vm0, %v688_v0  ;;  %533 = vmatpush3.bf16.msra.mxu1 %v586_v11 }
  0x4d   :  { %534 = vmatprep.subr.bf16.mxu1 %v688_v0 }
  0x50   :  { %535 = vmatpush3.bf16.msra.mxu1 %v587_v13 }
  0x51   :  { %536 = vmatprep.subr.bf16.mxu1 %v688_v0 }
  0x53   :  { %519 = vmatmul.mubr.msk.bf16.gmra.mrb[8].mxu0 %vm114_vm1, %v797_v12 }
  0x54   :  { %556 = vmatprep.mubr.msk.bf16.mxu0 %vm689_vm0, %v688_v0  ;;  %537 = vmatpush3.bf16.msra.mxu1 %v588_v14 }
 0x116   :  { %v158_v16 = vpop.f32.mrb[0].mxu0 }
 0x117   :  { %v159_v17 = vadd.f32 %v459_v15, %v158_v16  ;;  %v512_v18 = vpop.f32.mrb[1].mxu0 }
 0x118   :  { %v161_v19 = vpop.f32.mrb[2].mxu0 }
 0x119   :  { %v162_v20 = vadd.f32 %v459_v15, %v161_v19  ;;  %v513_v21 = vpop.f32.mrb[3].mxu0  ;;  %v181_v22 = vmax.f32 %v159_v17, 0.0 }
 0x11b   :  { %v182_v23 = vmax.f32 %v162_v20, 0.0 }
 0x11d   :  { %v187_v24 = vpack.c.bf16 %v182_v23, %v181_v22 }
 0x11e   :  { %v166_v25 = vpop.f32.mrb[4].mxu0 }
 0x11f   :  { %v167_v26 = vadd.f32 %v459_v15, %v166_v25  ;;  %v516_v27 = vpop.f32.mrb[5].mxu0  ;;  %539 = vmatmul.mubr.bf16.vlgmr.msra.gmra.mrb[0].mxu1 %v187_v24 }
 0x120   :  { %v169_v28 = vpop.f32.mrb[6].mxu0  ;;  %542 = vmatprep.mubr.msk.bf16.mxu1 %vm689_vm0, %v688_v0 }
 0x121   :  { %v170_v29 = vadd.f32 %v459_v15, %v169_v28  ;;  %v517_v30 = vpop.f32.mrb[7].mxu0  ;;  %v183_v31 = vmax.f32 %v167_v26, 0.0 }
 0x123   :  { %v184_v32 = vmax.f32 %v170_v29, 0.0 }
 0x125   :  { %v188_v33 = vpack.c.bf16 %v184_v32, %v183_v31 }
 0x126   :  { %v174_v34 = vpop.f32.mrb[8].mxu0 }
 0x127   :  { %v175_v35 = vadd.f32 %v459_v15, %v174_v34  ;;  %v520_v36 = vpop.f32.mrb[9].mxu0  ;;  %543 = vmatmul.mubr.bf16.gmra.mrb[4].mxu1 %v188_v33 }
 0x128   :  { %v177_v37 = vpop.f32.mrb[10].mxu0  ;;  %546 = vmatprep.mubr.msk.bf16.mxu1 %vm689_vm0, %v688_v0 }
 0x129   :  { %v178_v38 = vadd.f32 %v459_v15, %v177_v37  ;;  %v521_v39 = vpop.f32.mrb[11].mxu0  ;;  %v185_v40 = vmax.f32 %v175_v35, 0.0 }
 0x12b   :  { %v186_v41 = vmax.f32 %v178_v38, 0.0 }
 0x12d   :  { %v189_v42 = vpack.c.bf16 %v186_v41, %v185_v40 }
 0x12f   :  { %547 = vmatmul.mubr.bf16.gmra.mrb[8].mxu1 %v189_v42 }
 0x1f2   :  { %v288_v43 = vpop.f32.mrb[0].mxu1 }
 0x1f3   :  { %v540_v44 = vpop.f32.mrb[1].mxu1 }
 0x1f4   :  { %v291_v45 = vpop.f32.mrb[2].mxu1 }
 0x1f5   :  { %v311_v46 = vpack.c.bf16 %v291_v45, %v288_v43  ;;  %v541_v47 = vpop.f32.mrb[3].mxu1 }
 0x1f7   :  { %551 = vmatpush3.bf16.msra.mxu0 %v311_v46 }
 0x1f8   :  { %552 = vmatprep.subr.bf16.mxu0 %v688_v0 }
 0x1fa   :  { %v296_v48 = vpop.f32.mrb[4].mxu1 }
 0x1fb   :  { %v544_v49 = vpop.f32.mrb[5].mxu1 }
 0x1fc   :  { %v299_v50 = vpop.f32.mrb[6].mxu1 }
 0x1fd   :  { %v312_v51 = vpack.c.bf16 %v299_v50, %v296_v48  ;;  %v545_v52 = vpop.f32.mrb[7].mxu1 }
 0x1ff   :  { %553 = vmatpush3.bf16.msra.mxu0 %v312_v51 }
 0x200   :  { %554 = vmatprep.subr.bf16.mxu0 %v688_v0 }
 0x202   :  { %v304_v53 = vpop.f32.mrb[8].mxu1 }
 0x203   :  { %v548_v54 = vpop.f32.mrb[9].mxu1 }
 0x204   :  { %v307_v55 = vpop.f32.mrb[10].mxu1 }
 0x205   :  { %v313_v56 = vpack.c.bf16 %v307_v55, %v304_v53  ;;  %v549_v57 = vpop.f32.mrb[11].mxu1 }
 0x207   :  { %555 = vmatpush3.bf16.msra.mxu0 %v313_v56 }
 0x20a   :  { %557 = vmatmul.mubr.msk.bf16.vlgmr.msra.gmra.mrb[12].mxu0 %vm114_vm1, %v780_v6 }
 0x20b   :  { %560 = vmatprep.mubr.msk.bf16.mxu0 %vm689_vm0, %v688_v0 }
 0x212   :  { %561 = vmatmul.mubr.msk.bf16.gmra.mrb[16].mxu0 %vm114_vm1, %v789_v9 }
 0x213   :  { %564 = vmatprep.mubr.msk.bf16.mxu0 %vm689_vm0, %v688_v0 }
 0x21a   :  { %565 = vmatmul.mubr.msk.bf16.gmra.mrb[20].mxu0 %vm114_vm1, %v797_v12 }
 0x2dd   :  { %v355_v61 = vpop.f32.mrb[12].mxu0 }
 0x2de   :  { %v356_v62 = vadd.f32 %v477_v60, %v355_v61  ;;  %v558_v63 = vpop.f32.mrb[13].mxu0 }
 0x2df   :  { %v358_v1 = vpop.f32.mrb[14].mxu0 }
 0x2e0   :  { %v381_v2 = vsel %vm380_vm2, %v356_v62, -inf  ;;  %v359_v3 = vadd.f32 %v477_v60, %v358_v1  ;;  %v559_v4 = vpop.f32.mrb[15].mxu0 }
 0x2e1   :  { %387 = vmax.xlane.f32.xlu0 %v381_v2 }
 0x2e2   :  { %v382_v0 = vsel %vm380_vm2, %v359_v3, -inf }
 0x2e5   :  { %389 = vmax.xlane.f32.xlu0 %v382_v0  ;;  %v363_v5 = vpop.f32.mrb[16].mxu0 }
 0x2e6   :  { %v364_v6 = vadd.f32 %v477_v60, %v363_v5  ;;  %v562_v7 = vpop.f32.mrb[17].mxu0 }
 0x2e7   :  { %v366_v8 = vpop.f32.mrb[18].mxu0 }
 0x2e8   :  { %v383_v9 = vsel %vm380_vm2, %v364_v6, -inf  ;;  %v367_v10 = vadd.f32 %v477_v60, %v366_v8  ;;  %v563_v11 = vpop.f32.mrb[19].mxu0 }
 0x2e9   :  { %391 = vmax.xlane.f32.xlu1 %v383_v9 }
 0x2ea   :  { %v384_v12 = vsel %vm380_vm2, %v367_v10, -inf }
 0x2ed   :  { %393 = vmax.xlane.f32.xlu1 %v384_v12  ;;  %v371_v13 = vpop.f32.mrb[20].mxu0 }
 0x2ee   :  { %v372_v14 = vadd.f32 %v477_v60, %v371_v13  ;;  %v566_v15 = vpop.f32.mrb[21].mxu0 }
 0x2ef   :  { %v374_v16 = vpop.f32.mrb[22].mxu0 }
 0x2f0   :  { %v375_v17 = vadd.f32 %v477_v60, %v374_v16  ;;  %v385_v18 = vsel %vm380_vm2, %v372_v14, -inf  ;;  %v567_v19 = vpop.f32.mrb[23].mxu0 }
 0x2f1   :  { %395 = vmax.xlane.f32.xlu0 %v385_v18 }
 0x2f2   :  { %v386_v20 = vsel %vm380_vm2, %v375_v17, -inf }
 0x2f3   :  { %397 = vmax.xlane.f32.xlu1 %v386_v20 }
 0x36e   :  { %v388_v21 = vpop.xlane.xlu0 %387 }
 0x36f   :  { %v399_v22 = vsub.f32 %v381_v2, %v388_v21 }
 0x371   :  { %v405_v23 = vmul.f32 1.442695, %v399_v22 }
 0x372   :  { %v390_v24 = vpop.xlane.xlu0 %389 }
 0x373   :  { %589 = vpow2.f32 %v405_v23  ;;  %v400_v25 = vsub.f32 %v382_v0, %v390_v24 }
 0x375   :  { %v407_v26 = vmul.f32 1.442695, %v400_v25 }
 0x376   :  { %v392_v27 = vpop.xlane.xlu1 %391 }
 0x377   :  { %591 = vpow2.f32 %v407_v26  ;;  %v401_v28 = vsub.f32 %v383_v9, %v392_v27 }
 0x379   :  { %v409_v29 = vmul.f32 1.442695, %v401_v28 }
 0x37a   :  { %v394_v30 = vpop.xlane.xlu1 %393 }
 0x37b   :  { %593 = vpow2.f32 %v409_v29  ;;  %v402_v31 = vsub.f32 %v384_v12, %v394_v30 }
 0x37d   :  { %v590_v32 = vpop.eup %589  ;;  %v411_v33 = vmul.f32 1.442695, %v402_v31 }
 0x37e   :  { %417 = vadd.xlane.f32.xlu0 %v590_v32  ;;  %v396_v34 = vpop.xlane.xlu0 %395 }
 0x37f   :  { %595 = vpow2.f32 %v411_v33  ;;  %v403_v35 = vsub.f32 %v385_v18, %v396_v34 }
 0x380   :  { %v398_v36 = vpop.xlane.xlu1 %397 }
 0x381   :  { %v592_v37 = vpop.eup %591  ;;  %v413_v38 = vmul.f32 1.442695, %v403_v35  ;;  %v404_v39 = vsub.f32 %v386_v20, %v398_v36 }
 0x382   :  { %419 = vadd.xlane.f32.xlu1 %v592_v37 }
 0x383   :  { %597 = vpow2.f32 %v413_v38  ;;  %v415_v40 = vmul.f32 1.442695, %v404_v39 }
 0x385   :  { %v594_v41 = vpop.eup %593  ;;  %599 = vpow2.f32 %v415_v40 }
 0x386   :  { %421 = vadd.xlane.f32.xlu0 %v594_v41 }
 0x389   :  { %v596_v42 = vpop.eup %595 }
 0x38a   :  { %423 = vadd.xlane.f32.xlu1 %v596_v42 }
 0x38d   :  { %v598_v43 = vpop.eup %597 }
 0x38e   :  { %425 = vadd.xlane.f32.xlu0 %v598_v43 }
 0x38f   :  { %v600_v44 = vpop.eup %599 }
 0x390   :  { %427 = vadd.xlane.f32.xlu1 %v600_v44 }
 0x40b   :  { %v418_v45 = vpop.xlane.xlu0 %417 }
 0x40c   :  { %601 = vlog2.f32 %v418_v45 }
 0x40f   :  { %v420_v46 = vpop.xlane.xlu1 %419 }
 0x410   :  { %603 = vlog2.f32 %v420_v46 }
 0x413   :  { %v422_v47 = vpop.xlane.xlu0 %421 }
 0x414   :  { %605 = vlog2.f32 %v422_v47 }
 0x416   :  { %v602_v48 = vpop.eup %601 }
 0x417   :  { %v430_v49 = vmul.f32 0.6931472, %v602_v48  ;;  %v424_v50 = vpop.xlane.xlu1 %423 }
 0x418   :  { %607 = vlog2.f32 %v424_v50 }
 0x419   :  { %v441_v51 = vsub.f32 %v399_v22, %v430_v49 }
 0x41a   :  { %v604_v52 = vpop.eup %603 }
 0x41b   :  { %447 = vst [vmem:[%s857_s5] sm:$0xff] %v441_v51  ;;  %v432_v53 = vmul.f32 0.6931472, %v604_v52  ;;  %v426_v54 = vpop.xlane.xlu0 %425 }
 0x41c   :  { %609 = vlog2.f32 %v426_v54 }
 0x41d   :  { %v442_v55 = vsub.f32 %v400_v25, %v432_v53  ;;  %v428_v56 = vpop.xlane.xlu1 %427 }
 0x41e   :  { %v606_v57 = vpop.eup %605  ;;  %611 = vlog2.f32 %v428_v56 }
 0x41f   :  { %448 = vst [vmem:[%s857_s5 + $0x8] sm:$0xff] %v442_v55  ;;  %v434_v58 = vmul.f32 0.6931472, %v606_v57 }
 0x421   :  { %v443_v59 = vsub.f32 %v401_v28, %v434_v58 }
 0x422   :  { %v608_v60 = vpop.eup %607 }
 0x423   :  { %449 = vst [vmem:[%s857_s5 + $0x10] sm:$0xff] %v443_v59  ;;  %v436_v61 = vmul.f32 0.6931472, %v608_v60 }
 0x425   :  { %v444_v62 = vsub.f32 %v402_v31, %v436_v61 }
 0x426   :  { %v610_v63 = vpop.eup %609 }
 0x427   :  { %450 = vst [vmem:[%s857_s5 + $0x18] sm:$0xff] %v444_v62  ;;  %v438_v1 = vmul.f32 0.6931472, %v610_v63 }
 0x428   :  { %v612_v2 = vpop.eup %611 }
 0x429   :  { %v445_v3 = vsub.f32 %v403_v35, %v438_v1  ;;  %v440_v4 = vmul.f32 0.6931472, %v612_v2 }
 0x42b   :  { %451 = vst [vmem:[%s857_s5 + $0x20] sm:$0xff] %v445_v3  ;;  %v446_v0 = vsub.f32 %v404_v39, %v440_v4 }
 0x42d   :  { %452 = vst [vmem:[%s857_s5 + $0x28] sm:$0xff] %v446_v0 }
 0x42e   :  { %457 = vsyncpa [#allocation3], 1 }
 0x42f   :  { %458 = vsyncpa [#allocation5], 1 }

</bundles_post_ra>
